<compile_context>
chip_gen: v7x
topology: tpu7x:2x2x1
jax: 0.10.0
libtpu: 0.0.40
codegen_flags: <defaults>
</compile_context>

<pallas_src>
import functools
import math

import jax
import jax.numpy as jnp
from jax.experimental import pallas as pl
from jax.experimental.pallas import tpu as pltpu


def _round_up(x, m):
    return ((x + m - 1) // m) * m


# ---------------------------------------------------------------------------
# One-time capability / hardware probes (resolved once, cached).
# ---------------------------------------------------------------------------

@functools.lru_cache(maxsize=1)
def _vmem_budget_bytes() -> int:
    """Physical VMEM per TensorCore minus ~15% headroom for compiler scratch."""
    try:
        cap = int(pltpu.get_tpu_info().vmem_capacity_bytes)
    except Exception:
        cap = 128 << 20                       # v5e / v6e default
    return int(cap * 0.85)


@functools.lru_cache(maxsize=1)
def _buffered_supported() -> bool:
    """Does this jax build accept pipeline_mode=pl.Buffered(1) on a BlockSpec?"""
    if not hasattr(pl, "Buffered"):
        return False
    try:
        spec = pl.BlockSpec((8, 128), lambda i: (0, 0),
                            pipeline_mode=pl.Buffered(1))

        def _probe(x_ref, o_ref):
            o_ref[...] = x_ref[...]

        fn = pl.pallas_call(
            _probe,
            out_shape=jax.ShapeDtypeStruct((8, 128), jnp.float32),
            grid=(1,),
            in_specs=[spec],
            out_specs=pl.BlockSpec((8, 128), lambda i: (0, 0)))
        jax.jit(fn).lower(
            jax.ShapeDtypeStruct((8, 128), jnp.float32)).compile()
        return True
    except Exception:
        return False


# ---------------------------------------------------------------------------
# Kernels
# ---------------------------------------------------------------------------

def _ffn_kernel(x_ref, w1_ref, b1_ref, w2_ref, b2_ref, o_ref):
    # MXU matmul (f32 acc) -> bias + ReLU (VPU, f32) -> MXU matmul -> bias.
    h = jnp.dot(x_ref[...], w1_ref[...], preferred_element_type=jnp.float32)
    h = jnp.maximum(h + b1_ref[...], 0.0)                  # (tm, Fp) + (1, Fp)
    y = jnp.dot(h.astype(w2_ref.dtype), w2_ref[...],
                preferred_element_type=jnp.float32)
    o_ref[...] = (y + b2_ref[...]).astype(o_ref.dtype)


def _ffn_kernel_fsplit(x_ref, w1_ref, b1_ref, w2_ref, b2_ref, o_ref, acc_ref):
    # Grid = (row tiles, ff chunks); ff axis is a reduction ("arbitrary").
    j = pl.program_id(1)

    @pl.when(j == 0)
    def _():
        acc_ref[...] = jnp.zeros_like(acc_ref)

    h = jnp.dot(x_ref[...], w1_ref[...], preferred_element_type=jnp.float32)
    h = jnp.maximum(h + b1_ref[...], 0.0)                  # (tm, tf) + (1, tf)
    acc_ref[...] += jnp.dot(h.astype(w2_ref.dtype), w2_ref[...],
                            preferred_element_type=jnp.float32)

    @pl.when(j == pl.num_programs(1) - 1)
    def _():
        o_ref[...] = (acc_ref[...] + b2_ref[...]).astype(o_ref.dtype)


# ---------------------------------------------------------------------------
# pallas_call builders
# ---------------------------------------------------------------------------

def _build_single(Mp, Hp, Fp, tm, matmul_dtype, out_dtype, budget, buffered_ok):
    isz = jnp.dtype(matmul_dtype).itemsize
    osz = jnp.dtype(out_dtype).itemsize

    if buffered_ok:
        def const(shape):
            return pl.BlockSpec(shape, lambda i: (0, 0),
                                pipeline_mode=pl.Buffered(1))
    else:
        def const(shape):
            return pl.BlockSpec(shape, lambda i: (0, 0))

    weight_bytes = 2 * Hp * Fp * isz + (Fp + Hp) * 4
    wmult = 1 if buffered_ok else 2
    act_bytes = 2 * tm * Hp * isz + 2 * tm * Hp * osz        # dbl-buffered x/out
    inter_bytes = tm * Fp * (4 + isz) + tm * Hp * 4          # h (f32 + bf16), y
    needed = wmult * weight_bytes + act_bytes + inter_bytes
    vmem_limit = int(min(max(needed * 3 // 2 + (4 << 20), 32 << 20), budget))

    flops = 4 * Mp * Hp * Fp
    bytes_accessed = Mp * Hp * (isz + osz) + weight_bytes

    return pl.pallas_call(
        _ffn_kernel,
        out_shape=jax.ShapeDtypeStruct((Mp, Hp), out_dtype),
        grid=(Mp // tm,),
        in_specs=[
            pl.BlockSpec((tm, Hp), lambda i: (i, 0)),        # x rows (pipelined)
            const((Hp, Fp)),                                 # w1 (resident)
            const((1, Fp)),                                  # b1 (resident, f32)
            const((Fp, Hp)),                                 # w2 (resident)
            const((1, Hp)),                                  # b2 (resident, f32)
        ],
        out_specs=pl.BlockSpec((tm, Hp), lambda i: (i, 0)),
        compiler_params=pltpu.CompilerParams(
            dimension_semantics=("parallel",),               # megacore on v7x
            vmem_limit_bytes=vmem_limit),
        cost_estimate=pl.CostEstimate(
            flops=int(flops), transcendentals=0,
            bytes_accessed=int(bytes_accessed)),
    )


def _build_fsplit(Mp, Hp, Fp, tm, tf, matmul_dtype, out_dtype, budget,
                  buffered_ok):
    isz = jnp.dtype(matmul_dtype).itemsize
    osz = jnp.dtype(out_dtype).itemsize
    gm, gf = Mp // tm, Fp // tf

    if buffered_ok:
        def const(shape):
            return pl.BlockSpec(shape, lambda i, j: (0, 0),
                                pipeline_mode=pl.Buffered(1))
    else:
        def const(shape):
            return pl.BlockSpec(shape, lambda i, j: (0, 0))

    chunk_bytes = 2 * (2 * Hp * tf * isz + tf * 4)           # w1/w2/b1 dbl-buf
    act_bytes = 2 * tm * Hp * isz + 2 * tm * Hp * osz
    inter_bytes = tm * tf * (4 + isz) + tm * Hp * 4
    acc_bytes = tm * Hp * 4
    needed = chunk_bytes + act_bytes + inter_bytes + acc_bytes + Hp * 4
    vmem_limit = int(min(max(needed * 3 // 2 + (4 << 20), 32 << 20), budget))

    flops = 4 * Mp * Hp * Fp
    weight_bytes = 2 * Hp * Fp * isz + (Fp + Hp) * 4
    bytes_accessed = Mp * Hp * (isz + osz) + gm * weight_bytes

    return pl.pallas_call(
        _ffn_kernel_fsplit,
        out_shape=jax.ShapeDtypeStruct((Mp, Hp), out_dtype),
        grid=(gm, gf),
        in_specs=[
            pl.BlockSpec((tm, Hp), lambda i, j: (i, 0)),     # x rows
            pl.BlockSpec((Hp, tf), lambda i, j: (0, j)),     # w1 ff-chunk
            pl.BlockSpec((1, tf), lambda i, j: (0, j)),      # b1 ff-chunk
            pl.BlockSpec((tf, Hp), lambda i, j: (j, 0)),     # w2 ff-chunk
            const((1, Hp)),                                  # b2 (resident)
        ],
        out_specs=pl.BlockSpec((tm, Hp), lambda i, j: (i, 0)),
        scratch_shapes=[pltpu.VMEM((tm, Hp), jnp.float32)],
        compiler_params=pltpu.CompilerParams(
            dimension_semantics=("parallel", "arbitrary"),
            vmem_limit_bytes=vmem_limit),
        cost_estimate=pl.CostEstimate(
            flops=int(flops), transcendentals=0,
            bytes_accessed=int(bytes_accessed)),
    )


# ---------------------------------------------------------------------------
# Tiling heuristics
# ---------------------------------------------------------------------------

def _choose_row_tile(M, budget, tm_req):
    if tm_req is None:
        # 128-MiB chips (v5e/v6e) take bigger row tiles; v7x (64 MiB) stays 256.
        tm_req = 512 if budget >= (96 << 20) else 256
    tm_req = max(16, _round_up(int(tm_req), 16))
    if M <= 16:
        return _round_up(max(M, 8), 8)
    if M <= tm_req:
        if M >= 32:
            # ensure >= 2 row steps so v7x's second TensorCore has work
            return _round_up((M + 1) // 2, 16)
        return _round_up(M, 16)
    return tm_req


def _needs_f_split(Hp, Fp, tm, isz, budget, buffered_ok):
    wmult = 1 if buffered_ok else 2
    weight_bytes = wmult * (2 * Hp * Fp * isz + (Fp + Hp) * 4)
    inter_bytes = tm * Fp * (4 + isz)
    act_bytes = 2 * tm * Hp * isz + 4 * tm * Hp * 4
    return weight_bytes + inter_bytes + act_bytes > int(budget * 0.6)


def _choose_f_tile(Hp, Fp, tm, isz, budget):
    # Largest divisor of Fp that is a multiple of 128 and fits the budget.
    n = Fp // 128
    resident = tm * Hp * 4 + 2 * tm * Hp * isz + 2 * tm * Hp * 4 + Hp * 4
    for d in sorted((d for d in range(1, n + 1) if n % d == 0), reverse=True):
        tf = 128 * d
        w_chunk = 2 * (2 * Hp * tf * isz + tf * 4)
        inter = tm * tf * (4 + isz)
        if resident + w_chunk + inter <= int(budget * 0.7):
            return tf
    return 128


# ---------------------------------------------------------------------------
# Forward (jitted) + parameter preparation
# ---------------------------------------------------------------------------

def _ffn_forward_impl(x, w1p, b1p, w2p, b2p, *, out_dtype_name, tm_req,
                      force_f_split, buffered_ok, budget):
    out_dtype = jnp.dtype(out_dtype_name)
    matmul_dtype = w1p.dtype
    isz = jnp.dtype(matmul_dtype).itemsize

    lead_shape = x.shape[:-1]
    H = x.shape[-1]
    Hp, Fp = w1p.shape
    M = int(math.prod(lead_shape))

    tm = _choose_row_tile(M, budget, tm_req)
    Mp = _round_up(M, tm)

    # Only pad/copy the activations when padding is actually required
    # (H % 128 == 0 and M % tm == 0 in the common real-model case).
    x2d = x.reshape(M, H).astype(matmul_dtype)
    padded = (Mp, Hp) != (M, H)
    if padded:
        # Zero padding keeps the math exact: padded x columns hit zero w1
        # rows, padded ff columns get b1=0 so ReLU(0)=0, padded output
        # columns are sliced off below.
        xk = jnp.zeros((Mp, Hp), matmul_dtype).at[:M, :H].set(x2d)
    else:
        xk = x2d

    if force_f_split or _needs_f_split(Hp, Fp, tm, isz, budget, buffered_ok):
        tf = _choose_f_tile(Hp, Fp, tm, isz, budget)
        call = _build_fsplit(Mp, Hp, Fp, tm, tf, matmul_dtype, out_dtype,
                             budget, buffered_ok)
    else:
        call = _build_single(Mp, Hp, Fp, tm, matmul_dtype, out_dtype,
                             budget, buffered_ok)

    out = call(xk, w1p, b1p, w2p, b2p)

    if padded:
        out = out[:M, :H]
    return out.reshape(*lead_shape, H)


_ffn_forward_jit = jax.jit(
    _ffn_forward_impl,
    static_argnames=("out_dtype_name", "tm_req", "force_f_split",
                     "buffered_ok", "budget"))


def prepare_ffn_params(w1, b1, w2, b2, matmul_dtype=jnp.bfloat16):
    """Pad/cast constant parameters ONCE; reuse the result across calls.

    Weights are stored transposed vs. torch.nn.Linear.weight:
      w1: [hidden, ff], b1: [ff], w2: [ff, hidden], b2: [hidden].
    Feature dims are padded to multiples of 128 for lane-dense MXU tiles.
    """
    H, F = w1.shape
    Hp = _round_up(max(H, 128), 128)
    Fp = _round_up(max(F, 128), 128)
    w1p = jnp.zeros((Hp, Fp), matmul_dtype).at[:H, :F].set(
        w1.astype(matmul_dtype))
    b1p = jnp.zeros((1, Fp), jnp.float32).at[0, :F].set(b1.astype(jnp.float32))
    w2p = jnp.zeros((Fp, Hp), matmul_dtype).at[:F, :H].set(
        w2.astype(matmul_dtype))
    b2p = jnp.zeros((1, Hp), jnp.float32).at[0, :H].set(b2.astype(jnp.float32))
    return (w1p, b1p, w2p, b2p)


def ffn_forward(x, params, *, tm=None, out_dtype=None, force_f_split=False):
    """x: [..., hidden] -> [..., hidden] using pre-prepared params."""
    w1p, b1p, w2p, b2p = params
    out_dtype = x.dtype if out_dtype is None else out_dtype
    return _ffn_forward_jit(
        x, w1p, b1p, w2p, b2p,
        out_dtype_name=jnp.dtype(out_dtype).name,
        tm_req=tm,
        force_f_split=bool(force_f_split),
        buffered_ok=_buffered_supported(),
        budget=_vmem_budget_bytes())


def ffn_forward_from_weights(x, w1, b1, w2, b2, **kw):
    """Convenience one-shot API (prepares params on every call — prefer
    prepare_ffn_params + ffn_forward in a model loop)."""
    return ffn_forward(x, prepare_ffn_params(w1, b1, w2, b2), **kw)


# ---------------------------------------------------------------------------
# Self-test
# ---------------------------------------------------------------------------

if __name__ == "__main__":
    # Small config consistent with the module: hidden_size=32, ff_size=64.
    batch, seq, hidden, ff = 2, 8, 32, 64

    key = jax.random.PRNGKey(0)
    kx, k1, k2, k3, k4 = jax.random.split(key, 5)

    x = jax.random.normal(kx, (batch, seq, hidden), dtype=jnp.float32)

    # Deterministic synthetic parameters (PyTorch Linear-ish uniform init).
    lim1 = 1.0 / (hidden ** 0.5)
    lim2 = 1.0 / (ff ** 0.5)
    w1 = jax.random.uniform(k1, (hidden, ff), jnp.float32, -lim1, lim1)
    b1 = jax.random.uniform(k2, (ff,), jnp.float32, -lim1, lim1)
    w2 = jax.random.uniform(k3, (ff, hidden), jnp.float32, -lim2, lim2)
    b2 = jax.random.uniform(k4, (hidden,), jnp.float32, -lim2, lim2)

    params = prepare_ffn_params(w1, b1, w2, b2)      # pad/cast weights ONCE

    # Fused single-pass path.
    y = ffn_forward(x, params)
    jax.block_until_ready(y)

    # Also exercise the F-split (accumulator) path at the same small shape.
    y_split = ffn_forward(x, params, force_f_split=True)
    jax.block_until_ready(y_split)

    # 1) semantic check vs. pure f32 reference (loose: bf16 matmul inputs).
    ref_f32 = jnp.maximum(x @ w1 + b1, 0.0) @ w2 + b2
    assert jnp.allclose(y, ref_f32, atol=3e-2, rtol=3e-2), \
        "mismatch vs f32 reference"

    # 2) tight check vs. a reference using the same bf16-rounded inputs.
    r = lambda a: a.astype(jnp.bfloat16).astype(jnp.float32)
    h_ref = jnp.maximum(r(x) @ r(w1) + b1, 0.0)
    ref_bf16 = r(h_ref) @ r(w2) + b2
    assert jnp.allclose(y, ref_bf16, atol=1e-3, rtol=1e-3), \
        "mismatch vs bf16-matched reference (single path)"
    assert jnp.allclose(y_split, ref_bf16, atol=1e-3, rtol=1e-3), \
        "mismatch vs bf16-matched reference (F-split path)"

    print("KERNEL_OK")
</pallas_src>

<mosaic_0001>
module attributes {stable_mosaic.version = 11 : i64} {
  func.func @_ffn_kernel(%arg0: i32, %arg1: memref<16x128xbf16, #tpu.memory_space<vmem>>, %arg2: memref<128x128xbf16, #tpu.memory_space<vmem>>, %arg3: memref<1x128xf32, #tpu.memory_space<vmem>>, %arg4: memref<128x128xbf16, #tpu.memory_space<vmem>>, %arg5: memref<1x128xf32, #tpu.memory_space<vmem>>, %arg6: memref<16x128xf32, #tpu.memory_space<vmem>>) attributes {dimension_semantics = [#tpu.dimension_semantics<parallel>], iteration_bounds = array<i64: 1>, scalar_prefetch = 0 : i64, scratch_operands = 0 : i64, tpu.core_type = #tpu.core_type<tc>, window_params = [{transform_indices = @transform_0, window_bounds = array<i64: 16, 128>}, {pipeline_mode = #tpu.pipeline_mode<synchronous>, transform_indices = @transform_1, window_bounds = array<i64: 128, 128>}, {pipeline_mode = #tpu.pipeline_mode<synchronous>, transform_indices = @transform_2, window_bounds = array<i64: 1, 128>}, {pipeline_mode = #tpu.pipeline_mode<synchronous>, transform_indices = @transform_3, window_bounds = array<i64: 128, 128>}, {pipeline_mode = #tpu.pipeline_mode<synchronous>, transform_indices = @transform_4, window_bounds = array<i64: 1, 128>}, {transform_indices = @transform_5, window_bounds = array<i64: 16, 128>}]} {
    %c0 = arith.constant 0 : index
    %c0_0 = arith.constant 0 : index
    %0 = vector.load %arg1[%c0, %c0_0] : memref<16x128xbf16, #tpu.memory_space<vmem>>, vector<16x128xbf16>
    %c0_1 = arith.constant 0 : index
    %c0_2 = arith.constant 0 : index
    %1 = vector.load %arg2[%c0_1, %c0_2] : memref<128x128xbf16, #tpu.memory_space<vmem>>, vector<128x128xbf16>
    %cst = arith.constant dense<0.000000e+00> : vector<16x128xf32>
    %2 = tpu.matmul %0, %1, %cst {dimension_numbers = #tpu.dot_dimension_numbers<[1], [0], [0], [1], [0, 0, 1, 1], [], []>} : vector<16x128xbf16>, vector<128x128xbf16>, vector<16x128xf32> -> vector<16x128xf32>
    %c0_3 = arith.constant 0 : index
    %c0_4 = arith.constant 0 : index
    %3 = vector.load %arg3[%c0_3, %c0_4] : memref<1x128xf32, #tpu.memory_space<vmem>>, vector<1x128xf32>
    %4 = vector.broadcast %3 : vector<1x128xf32> to vector<16x128xf32>
    %5 = arith.addf %2, %4 : vector<16x128xf32>
    %cst_5 = arith.constant 0.000000e+00 : f32
    %6 = vector.broadcast %cst_5 : f32 to vector<16x128xf32>
    %7 = arith.maximumf %5, %6 : vector<16x128xf32>
    %8 = arith.truncf %7 : vector<16x128xf32> to vector<16x128xbf16>
    %c0_6 = arith.constant 0 : index
    %c0_7 = arith.constant 0 : index
    %9 = vector.load %arg4[%c0_6, %c0_7] : memref<128x128xbf16, #tpu.memory_space<vmem>>, vector<128x128xbf16>
    %cst_8 = arith.constant dense<0.000000e+00> : vector<16x128xf32>
    %10 = tpu.matmul %8, %9, %cst_8 {dimension_numbers = #tpu.dot_dimension_numbers<[1], [0], [0], [1], [0, 0, 1, 1], [], []>} : vector<16x128xbf16>, vector<128x128xbf16>, vector<16x128xf32> -> vector<16x128xf32>
    %c0_9 = arith.constant 0 : index
    %c0_10 = arith.constant 0 : index
    %11 = vector.load %arg5[%c0_9, %c0_10] : memref<1x128xf32, #tpu.memory_space<vmem>>, vector<1x128xf32>
    %12 = vector.broadcast %11 : vector<1x128xf32> to vector<16x128xf32>
    %13 = arith.addf %10, %12 : vector<16x128xf32>
    %c0_11 = arith.constant 0 : index
    %c0_12 = arith.constant 0 : index
    %14 = vector.load %arg6[%c0_11, %c0_12] : memref<16x128xf32, #tpu.memory_space<vmem>>, vector<16x128xf32>
    tpu.vector_store %arg6[%c0_11, %c0_12], %13 {strides = array<i32>} : memref<16x128xf32, #tpu.memory_space<vmem>>, vector<16x128xf32>,
    return
  }
  func.func @transform_0(%arg0: i32) -> (i32, i32) {
    %c0_i32 = arith.constant 0 : i32
    %c0_i32_0 = arith.constant 0 : i32
    return %arg0, %c0_i32 : i32, i32
  }
  func.func @transform_1(%arg0: i32) -> (i32, i32) {
    %c0_i32 = arith.constant 0 : i32
    %c0_i32_0 = arith.constant 0 : i32
    %c0_i32_1 = arith.constant 0 : i32
    return %c0_i32, %c0_i32_0 : i32, i32
  }
  func.func @transform_2(%arg0: i32) -> (i32, i32) {
    %c0_i32 = arith.constant 0 : i32
    %c0_i32_0 = arith.constant 0 : i32
    %c0_i32_1 = arith.constant 0 : i32
    return %c0_i32, %c0_i32_0 : i32, i32
  }
  func.func @transform_3(%arg0: i32) -> (i32, i32) {
    %c0_i32 = arith.constant 0 : i32
    %c0_i32_0 = arith.constant 0 : i32
    %c0_i32_1 = arith.constant 0 : i32
    return %c0_i32, %c0_i32_0 : i32, i32
  }
  func.func @transform_4(%arg0: i32) -> (i32, i32) {
    %c0_i32 = arith.constant 0 : i32
    %c0_i32_0 = arith.constant 0 : i32
    %c0_i32_1 = arith.constant 0 : i32
    return %c0_i32, %c0_i32_0 : i32, i32
  }
  func.func @transform_5(%arg0: i32) -> (i32, i32) {
    %c0_i32 = arith.constant 0 : i32
    %c0_i32_0 = arith.constant 0 : i32
    return %arg0, %c0_i32 : i32, i32
  }
}

</mosaic_0001>

<bundles_post_ra>
// kernel: _ffn_forward_impl.1
= control target key start
LH: loop header
LB: loop body
LE: loop exit
PB: predicated region body
PF: predicated region fallthrough
CT: control target
= control target key end

     0   :  { %10 = vsyncpa [#allocation3], 0  ;;  %s515_s0 = inlined_call_operand.vmem [shape: bf16[16,128], index: 0, kind: input, shape index: {}]   ;;  %s516_s1 = inlined_call_operand.hbm [shape: bf16[128,128], index: 1, kind: input, shape index: {}]   ;;  %s517_s2 = inlined_call_operand.vmem [shape: f32[1,128], index: 2, kind: input, shape index: {}]   ;;  %s518_s3 = inlined_call_operand.hbm [shape: bf16[128,128], index: 3, kind: input, shape index: {}]   ;;  %s519_s4 = inlined_call_operand.vmem [shape: f32[1,128], index: 4, kind: input, shape index: {}]   ;;  %s520_s5 = inlined_call_operand.vmem [shape: f32[16,128], index: 5, kind: output, shape index: {}]  }
   0x1   :  { %11 = vsyncpa [#allocation5], 0  ;;  %s440_s18 = smov [#allocation2]   ;;  %s392_s22 = scalar_lea.hbm %s516_s1, 1024 }
   0x2   :  { %s19_s19 = sshll.u32 %s440_s18, 4  ;;  %p393_p0 = scmp.ne.s32.totalorder %s516_s1, %s392_s22  ;;  %s20_s19 = int_to_ptr.vmem [resolvable:$true] %s19_s19 }
   0x3   :  { %p396_p1 = scmp.lt.u32.totalorder %s392_s22, %s516_s1 }
   0x5   :  { %p398_p2 = pnand %p396_p1, %p393_p0 }
   0x7   :  { %401 = shalt.err (!%p398_p2)
}
   0x8   :  { %s402_s27 = scalar_lea.vmem %s20_s19, 1024  ;;  %p407_p4 = scmp.lt.s32.totalorder %s20_s19, %s20_s19 }
   0x9   :  { %p403_p3 = scmp.ne.s32.totalorder %s20_s19, %s402_s27  ;;  %p408_p5 = scmp.lt.s32.totalorder %s402_s27, %s402_s27 }
   0xb   :  { %p409_p6 = por %p408_p5, %p407_p4 }
   0xd   :  { %p410_p7 = pnand %p409_p6, %p403_p3 }
   0xf   :  { %413 = shalt.err (!%p410_p7)
}
  0x10   :  { %s441_s28 = smov 64   ;;  %s442_s29 = smov 4  }
  0x11   :  { %25 = dma.hbm_to_vmem [thread:$0]  %s516_s1, 1024, %s20_s19, [#allocation3], %s441_s28, %s441_s28, %s442_s29  }
  0x12   :  { %s443_s7 = smov [#allocation4]   ;;  %s414_s11 = scalar_lea.hbm %s518_s3, 1024 }
  0x13   :  { %s33_s8 = sshll.u32 %s443_s7, 4  ;;  %p415_p8 = scmp.ne.s32.totalorder %s518_s3, %s414_s11  ;;  %s34_s8 = int_to_ptr.vmem [resolvable:$true] %s33_s8 }
  0x14   :  { %p418_p9 = scmp.lt.u32.totalorder %s414_s11, %s518_s3 }
  0x16   :  { %p420_p10 = pnand %p418_p9, %p415_p8 }
  0x18   :  { %423 = shalt.err (!%p420_p10)
}
  0x19   :  { %s424_s16 = scalar_lea.vmem %s34_s8, 1024  ;;  %p429_p12 = scmp.lt.s32.totalorder %s34_s8, %s34_s8 }
  0x1a   :  { %p425_p11 = scmp.ne.s32.totalorder %s34_s8, %s424_s16  ;;  %p430_p13 = scmp.lt.s32.totalorder %s424_s16, %s424_s16 }
  0x1c   :  { %p431_p0 = por %p430_p13, %p429_p12 }
  0x1e   :  { %p432_p1 = pnand %p431_p0, %p425_p11 }
  0x20   :  { %435 = shalt.err (!%p432_p1)
}
  0x21   :  { %39 = dma.hbm_to_vmem [thread:$0]  %s518_s3, 1024, %s34_s8, [#allocation5], %s441_s28, %s441_s28, %s442_s29  }
  0x22   :  { %436 = dma.done.wait [#allocation3], 1024  }
  0x23   :  { %437 = vsyncadd [#allocation3], 4294966272 }
  0x24   :  { %438 = dma.done.wait [#allocation5], 1024  }
  0x25   :  { %439 = vsyncadd [#allocation5], 4294966272  ;;  %v444_v0 = vmov 0.0   ;;  %vm445_vm0 = vmmov 0   ;;  %v375_v1 = vld [vmem:[#allocation2] sm:$0xff]   ;;  %v376_v2 = vld [vmem:[#allocation2 + $0x8] sm:$0xff]  }
  0x26   :  { %329 = vmatprep.subr.bf16.mxu0 %v444_v0  ;;  %345 = vmatprep.mubr.msk.bf16.mxu0 %vm445_vm0, %v444_v0  ;;  %v377_v3 = vld [vmem:[#allocation2 + $0x10] sm:$0xff]   ;;  %v384_v4 = vld [vmem:[#allocation4] sm:$0xff]   ;;  %v378_v5 = vld [vmem:[#allocation2 + $0x18] sm:$0xff]  }
  0x27   :  { %349 = vmatprep.subr.bf16.mxu1 %v444_v0  ;;  %365 = vmatprep.mubr.msk.bf16.mxu1 %vm445_vm0, %v444_v0  ;;  %v385_v6 = vld [vmem:[#allocation4 + $0x8] sm:$0xff]   ;;  %v379_v7 = vld [vmem:[#allocation2 + $0x20] sm:$0xff]   ;;  %v386_v8 = vld [vmem:[#allocation4 + $0x10] sm:$0xff]  }
  0x28   :  { %330 = vmatpush3.bf16.msra.mxu0 %v375_v1  ;;  %350 = vmatpush3.bf16.msra.mxu1 %v384_v4  ;;  %v380_v9 = vld [vmem:[#allocation2 + $0x28] sm:$0xff]   ;;  %v387_v10 = vld [vmem:[#allocation4 + $0x18] sm:$0xff]   ;;  %v381_v11 = vld [vmem:[#allocation2 + $0x30] sm:$0xff]  }
  0x29   :  { %331 = vmatprep.subr.bf16.mxu0 %v444_v0  ;;  %351 = vmatprep.subr.bf16.mxu1 %v444_v0  ;;  %v388_v12 = vld [vmem:[#allocation4 + $0x20] sm:$0xff]   ;;  %v382_v13 = vld [vmem:[#allocation2 + $0x38] sm:$0xff]   ;;  %v389_v14 = vld [vmem:[#allocation4 + $0x28] sm:$0xff]  }
  0x2a   :  { %v383_v15 = vld [vmem:[%s515_s0] sm:$0xff]   ;;  %v390_v16 = vld [vmem:[#allocation4 + $0x30] sm:$0xff]   ;;  %v391_v17 = vld [vmem:[#allocation4 + $0x38] sm:$0xff]  }
  0x2b   :  { %v292_v18 = vld [vmem:[%s517_s2] ss:$0 sm:$0xff] }
  0x2c   :  { %332 = vmatpush3.bf16.msra.mxu0 %v376_v2  ;;  %352 = vmatpush3.bf16.msra.mxu1 %v385_v6  ;;  %v302_v28 = vld [vmem:[%s519_s4] ss:$0 sm:$0xff] }
  0x2d   :  { %333 = vmatprep.subr.bf16.mxu0 %v444_v0  ;;  %353 = vmatprep.subr.bf16.mxu1 %v444_v0 }
  0x30   :  { %334 = vmatpush3.bf16.msra.mxu0 %v377_v3  ;;  %354 = vmatpush3.bf16.msra.mxu1 %v386_v8 }
  0x31   :  { %335 = vmatprep.subr.bf16.mxu0 %v444_v0  ;;  %355 = vmatprep.subr.bf16.mxu1 %v444_v0 }
  0x34   :  { %336 = vmatpush3.bf16.msra.mxu0 %v378_v5  ;;  %356 = vmatpush3.bf16.msra.mxu1 %v387_v10 }
  0x35   :  { %337 = vmatprep.subr.bf16.mxu0 %v444_v0  ;;  %357 = vmatprep.subr.bf16.mxu1 %v444_v0 }
  0x38   :  { %338 = vmatpush3.bf16.msra.mxu0 %v379_v7  ;;  %358 = vmatpush3.bf16.msra.mxu1 %v388_v12 }
  0x39   :  { %339 = vmatprep.subr.bf16.mxu0 %v444_v0  ;;  %359 = vmatprep.subr.bf16.mxu1 %v444_v0 }
  0x3c   :  { %340 = vmatpush3.bf16.msra.mxu0 %v380_v9  ;;  %360 = vmatpush3.bf16.msra.mxu1 %v389_v14 }
  0x3d   :  { %341 = vmatprep.subr.bf16.mxu0 %v444_v0  ;;  %361 = vmatprep.subr.bf16.mxu1 %v444_v0 }
  0x40   :  { %342 = vmatpush3.bf16.msra.mxu0 %v381_v11  ;;  %362 = vmatpush3.bf16.msra.mxu1 %v390_v16 }
  0x41   :  { %343 = vmatprep.subr.bf16.mxu0 %v444_v0  ;;  %363 = vmatprep.subr.bf16.mxu1 %v444_v0 }
  0x44   :  { %344 = vmatpush3.bf16.msra.mxu0 %v382_v13  ;;  %364 = vmatpush3.bf16.msra.mxu1 %v391_v17 }
  0x47   :  { %346 = vmatmul.mubr.bf16.vlgmr.msra.gmra.mrb[0].mxu0 %v383_v15 }
 0x11a   :  { %v162_v19 = vpop.f32.mrb[0].mxu0 }
 0x11b   :  { %v163_v20 = vadd.f32 %v292_v18, %v162_v19  ;;  %v347_v21 = vpop.f32.mrb[1].mxu0 }
 0x11c   :  { %v165_v22 = vpop.f32.mrb[2].mxu0 }
 0x11d   :  { %v166_v23 = vadd.f32 %v292_v18, %v165_v22  ;;  %v348_v24 = vpop.f32.mrb[3].mxu0  ;;  %v169_v25 = vmax.f32 %v163_v20, 0.0 }
 0x11f   :  { %v170_v26 = vmax.f32 %v166_v23, 0.0 }
 0x121   :  { %v171_v27 = vpack.c.bf16 %v170_v26, %v169_v25 }
 0x123   :  { %366 = vmatmul.mubr.bf16.vlgmr.msra.gmra.mrb[0].mxu1 %v171_v27 }
 0x1f6   :  { %v277_v29 = vpop.f32.mrb[0].mxu1 }
 0x1f7   :  { %v278_v30 = vadd.f32 %v302_v28, %v277_v29  ;;  %v367_v31 = vpop.f32.mrb[1].mxu1 }
 0x1f8   :  { %v280_v32 = vpop.f32.mrb[2].mxu1 }
 0x1f9   :  { %284 = vst [vmem:[%s520_s5] sm:$0xff] %v278_v30  ;;  %v281_v33 = vadd.f32 %v302_v28, %v280_v32  ;;  %v368_v34 = vpop.f32.mrb[3].mxu1 }
 0x1fb   :  { %285 = vst [vmem:[%s520_s5 + $0x8] sm:$0xff] %v281_v33 }
 0x1fc   :  { %290 = vsyncpa [#allocation3], 1 }
 0x1fd   :  { %291 = vsyncpa [#allocation5], 1 }

</bundles_post_ra>
